<compile_context>
chip_gen: v7x
topology: tpu7x:2x2x1
jax: 0.10.0
libtpu: 0.0.40
codegen_flags: <defaults>
</compile_context>

<pallas_src>
import numpy as np
import jax
import jax.numpy as jnp
from jax import lax
from jax.experimental import pallas as pl
from jax.experimental.pallas import tpu as pltpu


_PROJECTION_DIM = 1280
_SINGLE_DIM = 256                                  # H
_CLASS_EMBED_COUNT = _PROJECTION_DIM // _SINGLE_DIM  # 5


# ----------------------------------------------------------------------------
# Pallas kernel: fused (one-hot gather) -> Linear -> SiLU -> Linear
# ----------------------------------------------------------------------------
def _adapter_kernel(idx_ref, table_ref, w1_ref, b1_ref, w2_ref, b2_ref, o_ref):
    m = o_ref.shape[0]
    n_classes = table_ref.shape[0]

    # Fused gather: one_hot(idx) @ table on the MXU.  Exact row selection
    # (0/1 weights, f32 accumulation) -- avoids an HBM round trip for a
    # separately gathered [M, K] intermediate and any gather-lowering issues.
    ids = idx_ref[...]                                              # [m, 1] i32
    cls = lax.broadcasted_iota(jnp.int32, (m, n_classes), 1)        # [m, C]
    onehot = (ids == cls).astype(jnp.bfloat16)                      # [m, C]
    x = jnp.dot(onehot, table_ref[...],
                preferred_element_type=jnp.float32).astype(jnp.bfloat16)  # [m, K]

    # Linear(K->H) -> SiLU -> Linear(H->H): bf16 MXU inputs, f32 accumulation,
    # f32 biases / SiLU, bf16 output store (kernel is writeback bound).
    h = jnp.dot(x, w1_ref[...], preferred_element_type=jnp.float32) + b1_ref[...]
    h = (h * jax.nn.sigmoid(h)).astype(jnp.bfloat16)                # SiLU (EUP)
    o = jnp.dot(h, w2_ref[...], preferred_element_type=jnp.float32) + b2_ref[...]
    o_ref[...] = o.astype(o_ref.dtype)


_TM_MAX = 1024            # max rows handled per grid step
_SINGLE_BLOCK_MAX = 1024  # up to this many rows -> one grid step, all in VMEM


def _round_up(x, m):
    return ((x + m - 1) // m) * m


def _choose_tm(m_rows):
    """Pick an M tile so the grid has an even (>=2) number of steps (v7x 2 TCs)."""
    n = pl.cdiv(m_rows, _TM_MAX)
    if n % 2:
        n += 1
    return _round_up(pl.cdiv(m_rows, n), 16)


def adapter_apply(idx, table, w1, b1, w2, b2):
    """idx: [M, 1] int32 class ids -> adapter(table[idx]) as [M, H] bf16."""
    M = idx.shape[0]
    C, K = table.shape
    H = w1.shape[1]
    assert w1.shape == (K, H) and w2.shape == (H, H)
    assert b1.shape == (1, H) and b2.shape == (1, H)

    if M <= _SINGLE_BLOCK_MAX:
        # Tiny/common case: one grid step; pad rows to a bf16-friendly multiple
        # of 16 (only a few int32 idx rows -- essentially free).
        Mp = max(16, _round_up(M, 16))
        tm = Mp
    else:
        # Large-M: no pad-to-tile copy; Pallas masks the ragged last tile.
        Mp = M
        tm = _choose_tm(M)
    if Mp != M:
        idx = jnp.pad(idx, ((0, Mp - M), (0, 0)))     # pad with class 0

    grid = (pl.cdiv(Mp, tm),)
    cost = pl.CostEstimate(
        flops=2 * Mp * (C * K + K * H + H * H),
        transcendentals=Mp * H,
        bytes_accessed=(Mp * 4                         # idx
                        + (C * K + K * H + H * H) * 2  # bf16 table + weights
                        + 2 * H * 4                    # f32 biases
                        + Mp * H * 2),                 # bf16 output
    )

    y = pl.pallas_call(
        _adapter_kernel,
        out_shape=jax.ShapeDtypeStruct((Mp, H), jnp.bfloat16),
        grid_spec=pltpu.PrefetchScalarGridSpec(
            num_scalar_prefetch=0,
            grid=grid,
            in_specs=[
                pl.BlockSpec((tm, 1), lambda i: (i, 0)),   # class ids (tiled)
                pl.BlockSpec((C, K), lambda i: (0, 0)),    # prompt table (resident)
                pl.BlockSpec((K, H), lambda i: (0, 0)),    # w1 (resident)
                pl.BlockSpec((1, H), lambda i: (0, 0)),    # b1
                pl.BlockSpec((H, H), lambda i: (0, 0)),    # w2 (resident)
                pl.BlockSpec((1, H), lambda i: (0, 0)),    # b2
            ],
            out_specs=pl.BlockSpec((tm, H), lambda i: (i, 0)),
        ),
        compiler_params=pltpu.CompilerParams(
            dimension_semantics=("parallel",)),
        cost_estimate=cost,
    )(idx, table, w1, b1, w2, b2)

    return y[:M] if Mp != M else y


# ----------------------------------------------------------------------------
# Single jitted device path: fused gather+MLP kernel -> (metadata) reshape
# ----------------------------------------------------------------------------
@jax.jit
def _adapter_forward(idx, table, w1, b1, w2, b2):
    y = adapter_apply(idx, table, w1, b1, w2, b2)          # [M, H] bf16
    bsz = idx.shape[0] // _CLASS_EMBED_COUNT
    return y.reshape(bsz, -1)                              # [bsz, 1280] bf16


# ----------------------------------------------------------------------------
# Module-equivalent wrapper (string -> index glue stays on host)
# ----------------------------------------------------------------------------
class ClassEmbedAdapterJAX:
    def __init__(self, class_names, text_embedding_dim=32, key=None):
        if key is None:
            key = jax.random.PRNGKey(0)
        self.class_names = list(class_names)
        self._str2int = {n: i for i, n in enumerate(self.class_names)}

        self.projection_class_embeddings_input_dim = _PROJECTION_DIM
        self.single_class_embedding_dim = _SINGLE_DIM
        self.class_embedding_count = _CLASS_EMBED_COUNT   # = 5
        self.text_embedding_dim = text_embedding_dim

        H = self.single_class_embedding_dim
        K = self.text_embedding_dim
        k_pe, k_w1, k_b1, k_w2, k_b2 = jax.random.split(key, 5)

        # TODO(synk): real module encodes class names with two frozen CLIP text
        # encoders; replaced with a deterministic random embedding table here.
        # Stored bf16-resident so the kernel reads half the bytes.
        self.prompt_embeds = jax.random.normal(
            k_pe, (len(self.class_names), K), jnp.float32).astype(jnp.bfloat16)

        # adapter = Linear(K,256) -> SiLU -> Linear(256,256); weights stored
        # pre-transposed (y = x @ w + b), bf16 for the MXU; biases stay f32.
        self.w1 = (jax.random.normal(k_w1, (K, H), jnp.float32) * 0.02
                   ).astype(jnp.bfloat16)
        self.b1 = jax.random.normal(k_b1, (1, H), jnp.float32) * 0.02
        self.w2 = (jax.random.normal(k_w2, (H, H), jnp.float32) * 0.02
                   ).astype(jnp.bfloat16)
        self.b2 = jax.random.normal(k_b2, (1, H), jnp.float32) * 0.02

        self._rng = np.random.RandomState(0)   # deterministic "randperm" stand-in

    def str2int(self, names):
        return [self._str2int[n] for n in names]

    def _build_indices(self, class_name):
        """Host-side: one int32 index row of length 5 per batch item."""
        count = self.class_embedding_count
        rows = []
        for names in class_name:
            names = names if names else ['None']
            ids = self.str2int(names)
            n = len(ids)
            if n <= count:
                ids = ids + [0] * (count - n)   # pad with prompt_embeds[0]
            else:
                perm = self._rng.permutation(n)[:count]
                ids = [ids[p] for p in perm]
            rows.append(ids)
        return np.asarray(rows, dtype=np.int32)            # [bsz, 5]

    def forward(self, class_name):
        assert isinstance(class_name, list)
        idx = self._build_indices(class_name)               # [bsz, 5] host int32
        idx = jnp.asarray(idx.reshape(-1, 1))               # [bsz*5, 1]
        # Output is bf16; cast downstream only if the consumer needs f32.
        return _adapter_forward(idx, self.prompt_embeds,
                                self.w1, self.b1, self.w2, self.b2)


# ----------------------------------------------------------------------------
# Reference (plain JAX, identical bf16/f32 mix) for sanity checks
# ----------------------------------------------------------------------------
def _reference(idx, table, w1, b1, w2, b2):
    x = jnp.take(table, idx.reshape(-1), axis=0)            # [M, K] bf16
    h = jnp.dot(x, w1, preferred_element_type=jnp.float32) + b1
    h = (h * jax.nn.sigmoid(h)).astype(jnp.bfloat16)
    o = jnp.dot(h, w2, preferred_element_type=jnp.float32) + b2
    return o.astype(jnp.bfloat16)


if __name__ == "__main__":
    names = ['None', 'cat', 'dog', 'bird', 'car', 'tree', 'house', 'boat']
    adapter = ClassEmbedAdapterJAX(names, text_embedding_dim=32,
                                   key=jax.random.PRNGKey(0))

    # batch of 2: one item with two class names, one empty (-> ['None'])
    class_name = [['cat', 'dog'], []]
    out = jax.block_until_ready(adapter.forward(class_name))
    assert out.shape == (2, 1280), out.shape
    assert out.dtype == jnp.bfloat16, out.dtype

    # Cross-check the fused Pallas gather+MLP against plain JAX.
    idx_ref = np.array([[adapter._str2int['cat']], [adapter._str2int['dog']],
                        [0], [0], [0],                      # padded with embed[0]
                        [adapter._str2int['None']], [0], [0], [0], [0]],
                       dtype=np.int32)
    y_ref = _reference(jnp.asarray(idx_ref), adapter.prompt_embeds,
                       adapter.w1, adapter.b1, adapter.w2, adapter.b2)
    np.testing.assert_allclose(np.asarray(out, np.float32),
                               np.asarray(y_ref.reshape(2, -1), np.float32),
                               rtol=2e-2, atol=2e-2)

    # Exercise the large-M tiled path (even grid >= 2, ragged masked last tile).
    M_big = 3000
    idx_big = jax.random.randint(jax.random.PRNGKey(7), (M_big, 1), 0,
                                 len(names), dtype=jnp.int32)
    y_big = jax.block_until_ready(
        adapter_apply(idx_big, adapter.prompt_embeds,
                      adapter.w1, adapter.b1, adapter.w2, adapter.b2))
    y_big_ref = _reference(idx_big, adapter.prompt_embeds,
                           adapter.w1, adapter.b1, adapter.w2, adapter.b2)
    np.testing.assert_allclose(np.asarray(y_big, np.float32),
                               np.asarray(y_big_ref, np.float32),
                               rtol=2e-2, atol=2e-2)

    print("KERNEL_OK")
</pallas_src>

<mosaic_0001>
module attributes {stable_mosaic.version = 11 : i64} {
  func.func @_adapter_kernel(%arg0: i32, %arg1: memref<16x1xi32, #tpu.memory_space<vmem>>, %arg2: memref<8x32xbf16, #tpu.memory_space<vmem>>, %arg3: memref<32x256xbf16, #tpu.memory_space<vmem>>, %arg4: memref<1x256xf32, #tpu.memory_space<vmem>>, %arg5: memref<256x256xbf16, #tpu.memory_space<vmem>>, %arg6: memref<1x256xf32, #tpu.memory_space<vmem>>, %arg7: memref<16x256xbf16, #tpu.memory_space<vmem>>) attributes {dimension_semantics = [#tpu.dimension_semantics<parallel>], iteration_bounds = array<i64: 1>, scalar_prefetch = 0 : i64, scratch_operands = 0 : i64, tpu.core_type = #tpu.core_type<tc>, window_params = [{transform_indices = @transform_0, window_bounds = array<i64: 16, 1>}, {pipeline_mode = #tpu.pipeline_mode<synchronous>, transform_indices = @transform_1, window_bounds = array<i64: 8, 32>}, {pipeline_mode = #tpu.pipeline_mode<synchronous>, transform_indices = @transform_2, window_bounds = array<i64: 32, 256>}, {pipeline_mode = #tpu.pipeline_mode<synchronous>, transform_indices = @transform_3, window_bounds = array<i64: 1, 256>}, {pipeline_mode = #tpu.pipeline_mode<synchronous>, transform_indices = @transform_4, window_bounds = array<i64: 256, 256>}, {pipeline_mode = #tpu.pipeline_mode<synchronous>, transform_indices = @transform_5, window_bounds = array<i64: 1, 256>}, {transform_indices = @transform_6, window_bounds = array<i64: 16, 256>}]} {
    %c0 = arith.constant 0 : index
    %c0_0 = arith.constant 0 : index
    %0 = vector.load %arg1[%c0, %c0_0] : memref<16x1xi32, #tpu.memory_space<vmem>>, vector<16x1xi32>
    %1 = tpu.iota {dimensions = array<i32: 1>} : vector<16x8xi32>
    %2 = vector.broadcast %0 : vector<16x1xi32> to vector<16x8xi32>
    %3 = arith.cmpi eq, %2, %1 : vector<16x8xi32>
    %4 = arith.extui %3 : vector<16x8xi1> to vector<16x8xi32>
    %5 = arith.sitofp %4 : vector<16x8xi32> to vector<16x8xf32>
    %6 = arith.truncf %5 : vector<16x8xf32> to vector<16x8xbf16>
    %c0_1 = arith.constant 0 : index
    %c0_2 = arith.constant 0 : index
    %7 = vector.load %arg2[%c0_1, %c0_2] : memref<8x32xbf16, #tpu.memory_space<vmem>>, vector<8x32xbf16>
    %cst = arith.constant dense<0.000000e+00> : vector<16x32xf32>
    %8 = tpu.matmul %6, %7, %cst {dimension_numbers = #tpu.dot_dimension_numbers<[1], [0], [0], [1], [0, 0, 1, 1], [], []>} : vector<16x8xbf16>, vector<8x32xbf16>, vector<16x32xf32> -> vector<16x32xf32>
    %9 = arith.truncf %8 : vector<16x32xf32> to vector<16x32xbf16>
    %c0_3 = arith.constant 0 : index
    %c0_4 = arith.constant 0 : index
    %10 = vector.load %arg3[%c0_3, %c0_4] : memref<32x256xbf16, #tpu.memory_space<vmem>>, vector<32x256xbf16>
    %cst_5 = arith.constant dense<0.000000e+00> : vector<16x256xf32>
    %11 = tpu.matmul %9, %10, %cst_5 {dimension_numbers = #tpu.dot_dimension_numbers<[1], [0], [0], [1], [0, 0, 1, 1], [], []>} : vector<16x32xbf16>, vector<32x256xbf16>, vector<16x256xf32> -> vector<16x256xf32>
    %c0_6 = arith.constant 0 : index
    %c0_7 = arith.constant 0 : index
    %12 = vector.load %arg4[%c0_6, %c0_7] : memref<1x256xf32, #tpu.memory_space<vmem>>, vector<1x256xf32>
    %13 = vector.broadcast %12 : vector<1x256xf32> to vector<16x256xf32>
    %14 = arith.addf %11, %13 : vector<16x256xf32>
    %15 = arith.negf %14 : vector<16x256xf32>
    %16 = math.exp %15 : vector<16x256xf32>
    %cst_8 = arith.constant 1.000000e+00 : f32
    %17 = vector.broadcast %cst_8 : f32 to vector<16x256xf32>
    %18 = arith.addf %17, %16 : vector<16x256xf32>
    %19 = arith.divf %17, %18 : vector<16x256xf32>
    %20 = arith.mulf %14, %19 : vector<16x256xf32>
    %21 = arith.truncf %20 : vector<16x256xf32> to vector<16x256xbf16>
    %c0_9 = arith.constant 0 : index
    %c0_10 = arith.constant 0 : index
    %22 = vector.load %arg5[%c0_9, %c0_10] : memref<256x256xbf16, #tpu.memory_space<vmem>>, vector<256x256xbf16>
    %cst_11 = arith.constant dense<0.000000e+00> : vector<16x256xf32>
    %23 = tpu.matmul %21, %22, %cst_11 {dimension_numbers = #tpu.dot_dimension_numbers<[1], [0], [0], [1], [0, 0, 1, 1], [], []>} : vector<16x256xbf16>, vector<256x256xbf16>, vector<16x256xf32> -> vector<16x256xf32>
    %c0_12 = arith.constant 0 : index
    %c0_13 = arith.constant 0 : index
    %24 = vector.load %arg6[%c0_12, %c0_13] : memref<1x256xf32, #tpu.memory_space<vmem>>, vector<1x256xf32>
    %25 = vector.broadcast %24 : vector<1x256xf32> to vector<16x256xf32>
    %26 = arith.addf %23, %25 : vector<16x256xf32>
    %27 = arith.truncf %26 : vector<16x256xf32> to vector<16x256xbf16>
    %c0_14 = arith.constant 0 : index
    %c0_15 = arith.constant 0 : index
    %28 = vector.load %arg7[%c0_14, %c0_15] : memref<16x256xbf16, #tpu.memory_space<vmem>>, vector<16x256xbf16>
    tpu.vector_store %arg7[%c0_14, %c0_15], %27 {strides = array<i32>} : memref<16x256xbf16, #tpu.memory_space<vmem>>, vector<16x256xbf16>,
    return
  }
  func.func @transform_0(%arg0: i32) -> (i32, i32) {
    %c0_i32 = arith.constant 0 : i32
    %c0_i32_0 = arith.constant 0 : i32
    return %arg0, %c0_i32 : i32, i32
  }
  func.func @transform_1(%arg0: i32) -> (i32, i32) {
    %c0_i32 = arith.constant 0 : i32
    %c0_i32_0 = arith.constant 0 : i32
    %c0_i32_1 = arith.constant 0 : i32
    return %c0_i32, %c0_i32_0 : i32, i32
  }
  func.func @transform_2(%arg0: i32) -> (i32, i32) {
    %c0_i32 = arith.constant 0 : i32
    %c0_i32_0 = arith.constant 0 : i32
    %c0_i32_1 = arith.constant 0 : i32
    return %c0_i32, %c0_i32_0 : i32, i32
  }
  func.func @transform_3(%arg0: i32) -> (i32, i32) {
    %c0_i32 = arith.constant 0 : i32
    %c0_i32_0 = arith.constant 0 : i32
    %c0_i32_1 = arith.constant 0 : i32
    return %c0_i32, %c0_i32_0 : i32, i32
  }
  func.func @transform_4(%arg0: i32) -> (i32, i32) {
    %c0_i32 = arith.constant 0 : i32
    %c0_i32_0 = arith.constant 0 : i32
    %c0_i32_1 = arith.constant 0 : i32
    return %c0_i32, %c0_i32_0 : i32, i32
  }
  func.func @transform_5(%arg0: i32) -> (i32, i32) {
    %c0_i32 = arith.constant 0 : i32
    %c0_i32_0 = arith.constant 0 : i32
    %c0_i32_1 = arith.constant 0 : i32
    return %c0_i32, %c0_i32_0 : i32, i32
  }
  func.func @transform_6(%arg0: i32) -> (i32, i32) {
    %c0_i32 = arith.constant 0 : i32
    %c0_i32_0 = arith.constant 0 : i32
    return %arg0, %c0_i32 : i32, i32
  }
}

</mosaic_0001>

<bundles_post_ra>
// kernel: _adapter_forward.1
= control target key start
LH: loop header
LB: loop body
LE: loop exit
PB: predicated region body
PF: predicated region fallthrough
CT: control target
= control target key end

     0   :  { %11 = vsyncpa [#allocation3], 0  ;;  %s642_s21 = smov [#allocation2]   ;;  %s730_s0 = inlined_call_operand.vmem [shape: s32[16,1], index: 0, kind: input, shape index: {}]   ;;  %s731_s1 = inlined_call_operand.vmem [shape: bf16[8,32], index: 1, kind: input, shape index: {}]   ;;  %s732_s2 = inlined_call_operand.vmem [shape: bf16[32,256], index: 2, kind: input, shape index: {}]   ;;  %s733_s3 = inlined_call_operand.vmem [shape: f32[1,256], index: 3, kind: input, shape index: {}]   ;;  %s734_s4 = inlined_call_operand.hbm [shape: bf16[256,256], index: 4, kind: input, shape index: {}]   ;;  %s735_s5 = inlined_call_operand.vmem [shape: f32[1,256], index: 5, kind: input, shape index: {}]   ;;  %s736_s6 = inlined_call_operand.vmem [shape: bf16[16,256], index: 6, kind: output, shape index: {}]  }
   0x1   :  { %s25_s22 = sshll.u32 %s642_s21, 4  ;;  %s618_s25 = scalar_lea.hbm %s734_s4, 4096  ;;  %s26_s22 = int_to_ptr.vmem [resolvable:$true] %s25_s22 }
   0x2   :  { %p619_p0 = scmp.ne.s32.totalorder %s734_s4, %s618_s25  ;;  %p622_p1 = scmp.lt.u32.totalorder %s618_s25, %s734_s4 }
   0x4   :  { %p624_p2 = pnand %p622_p1, %p619_p0 }
   0x6   :  { %627 = shalt.err (!%p624_p2)
}
   0x7   :  { %s628_s30 = scalar_lea.vmem %s26_s22, 4096  ;;  %p633_p4 = scmp.lt.s32.totalorder %s26_s22, %s26_s22 }
   0x8   :  { %p629_p3 = scmp.ne.s32.totalorder %s26_s22, %s628_s30  ;;  %p634_p5 = scmp.lt.s32.totalorder %s628_s30, %s628_s30 }
   0xa   :  { %p635_p6 = por %p634_p5, %p633_p4 }
   0xc   :  { %p636_p7 = pnand %p635_p6, %p629_p3 }
   0xe   :  { %639 = shalt.err (!%p636_p7)
}
   0xf   :  { %s643_s7 = smov 128   ;;  %s644_s8 = smov 8  }
  0x10   :  { %31 = dma.hbm_to_vmem [thread:$0]  %s734_s4, 4096, %s26_s22, [#allocation3], %s643_s7, %s643_s7, %s644_s8  }
  0x11   :  { %640 = dma.done.wait [#allocation3], 4096  }
  0x12   :  { %641 = vsyncadd [#allocation3], 4294963200  ;;  %v645_v0 = vmov 0   ;;  %v646_v1 = vmov 0.0   ;;  %v38_v2 = vld [vmem:[%s730_s0] sm:$0xff]  ;;  %v39_v3 = vld [vmem:[%s730_s0 + $0x8] sm:$0xff]  ;;  %v40_v7 = vlaneseq }
  0x13   :  { %547 = vset.pattern.permute.xlu0 %v645_v0  ;;  %535 = vmatprep.subr.bf16.mxu1 %v646_v1  ;;  %v55_v4 = vld [vmem:[%s731_s1] sm:$0xf]  ;;  %vm60_vm0 = vcmask 1043456   ;;  %vm647_vm1 = vmmov 0   ;;  %v550_v6 = vld [vmem:[%s732_s2 + $0x4] ss:$8 sps:$4 sm:$0xff]  }
  0x14   :  { %43 = vperm.xlu0 %547, %v38_v2   ;;  %v62_v5 = vsel %vm60_vm0, %v55_v4, 0  ;;  %537 = vmatprep.mubr.msk.bf16.mxu1 %vm647_vm1, %v646_v1  ;;  %v41_v8 = vand.u32 127, %v40_v7  ;;  %vm56_vm4 = vcmask 64512   ;;  %v548_v13 = vld [vmem:[%s732_s2] ss:$8 sps:$4 sm:$0xff]   ;;  %vm142_vm5 = vcmask 261120  }
  0x15   :  { %536 = vmatpush3.bf16.msra.mxu1 %v62_v5  ;;  %v553_v15 = vld [vmem:[%s732_s2 + $0x14] ss:$8 sps:$4 sm:$0xff]   ;;  %v551_v16 = vld [vmem:[%s732_s2 + $0x10] ss:$8 sps:$4 sm:$0xff]   ;;  %v554_v17 = vld [vmem:[#allocation2 + $0x4] ss:$8 sps:$4 sm:$0xff]  }
  0x16   :  { %146 = vmatprep.subr.bf16.mxu1 %v550_v6  ;;  %v556_v18 = vld [vmem:[#allocation2] ss:$8 sps:$4 sm:$0xff]   ;;  %v557_v19 = vld [vmem:[#allocation2 + $0x14] ss:$8 sps:$4 sm:$0xff]   ;;  %423 = vmatprep.subr.bf16.mxu0 %v554_v17  ;;  %v559_v20 = vld [vmem:[#allocation2 + $0x10] ss:$8 sps:$4 sm:$0xff]  }
  0x17   :  { %424 = vmatpush1.bf16.msra.mxu0 %v556_v18  ;;  %v560_v21 = vld [vmem:[#allocation2 + $0x24] ss:$8 sps:$4 sm:$0xff]   ;;  %v562_v22 = vld [vmem:[#allocation2 + $0x20] ss:$8 sps:$4 sm:$0xff]   ;;  %v563_v23 = vld [vmem:[#allocation2 + $0x34] ss:$8 sps:$4 sm:$0xff]  }
  0x18   :  { %46 = vperm.xlu0 %547, %v39_v3   ;;  %425 = vmatprep.subr.bf16.mxu0 %v557_v19  ;;  %v565_v24 = vld [vmem:[#allocation2 + $0x30] ss:$8 sps:$4 sm:$0xff]   ;;  %v566_v25 = vld [vmem:[#allocation2 + $0x44] ss:$8 sps:$4 sm:$0xff]   ;;  %v568_v26 = vld [vmem:[#allocation2 + $0x40] ss:$8 sps:$4 sm:$0xff]  }
  0x19   :  { %v569_v27 = vld [vmem:[#allocation2 + $0x54] ss:$8 sps:$4 sm:$0xff]   ;;  %v571_v28 = vld [vmem:[#allocation2 + $0x50] ss:$8 sps:$4 sm:$0xff]   ;;  %v572_v29 = vld [vmem:[#allocation2 + $0x64] ss:$8 sps:$4 sm:$0xff]  }
  0x1a   :  { %v574_v30 = vld [vmem:[#allocation2 + $0x60] ss:$8 sps:$4 sm:$0xff]   ;;  %v575_v36 = vld [vmem:[#allocation2 + $0x74] ss:$8 sps:$4 sm:$0xff]   ;;  %v577_v37 = vld [vmem:[#allocation2 + $0x70] ss:$8 sps:$4 sm:$0xff]  }
  0x1b   :  { %426 = vmatpush1.bf16.msra.mxu0 %v559_v20  ;;  %v578_v38 = vld [vmem:[#allocation2 + $0x84] ss:$8 sps:$4 sm:$0xff]   ;;  %v580_v39 = vld [vmem:[#allocation2 + $0x80] ss:$8 sps:$4 sm:$0xff]   ;;  %v581_v40 = vld [vmem:[#allocation2 + $0x94] ss:$8 sps:$4 sm:$0xff]  }
  0x1c   :  { %427 = vmatprep.subr.bf16.mxu0 %v560_v21  ;;  %v583_v41 = vld [vmem:[#allocation2 + $0x90] ss:$8 sps:$4 sm:$0xff]   ;;  %v584_v42 = vld [vmem:[#allocation2 + $0xa4] ss:$8 sps:$4 sm:$0xff]   ;;  %v586_v43 = vld [vmem:[#allocation2 + $0xa0] ss:$8 sps:$4 sm:$0xff]  }
  0x1d   :  { %v587_v44 = vld [vmem:[#allocation2 + $0xb4] ss:$8 sps:$4 sm:$0xff]   ;;  %v589_v45 = vld [vmem:[#allocation2 + $0xb0] ss:$8 sps:$4 sm:$0xff]   ;;  %v590_v46 = vld [vmem:[#allocation2 + $0xc4] ss:$8 sps:$4 sm:$0xff]  }
  0x1e   :  { %v592_v47 = vld [vmem:[#allocation2 + $0xc0] ss:$8 sps:$4 sm:$0xff]   ;;  %v593_v48 = vld [vmem:[#allocation2 + $0xd4] ss:$8 sps:$4 sm:$0xff]   ;;  %v595_v49 = vld [vmem:[#allocation2 + $0xd0] ss:$8 sps:$4 sm:$0xff]  }
  0x1f   :  { %428 = vmatpush1.bf16.msra.mxu0 %v562_v22  ;;  %v596_v50 = vld [vmem:[#allocation2 + $0xe4] ss:$8 sps:$4 sm:$0xff]   ;;  %v598_v51 = vld [vmem:[#allocation2 + $0xe0] ss:$8 sps:$4 sm:$0xff]   ;;  %v599_v52 = vld [vmem:[#allocation2 + $0xf4] ss:$8 sps:$4 sm:$0xff]  }
  0x20   :  { %429 = vmatprep.subr.bf16.mxu0 %v563_v23  ;;  %v601_v53 = vld [vmem:[#allocation2 + $0xf0] ss:$8 sps:$4 sm:$0xff]   ;;  %v113_v54 = vshrl.u32 %v40_v7, 7  ;;  %v110_v56 = vld [vmem:[%s733_s3] sm:$0x3] }
  0x22   :  { %v114_v55 = vsub.s32 0, %v113_v54  ;;  %v118_v57 = vsub.s32 1, %v113_v54 }
  0x23   :  { %430 = vmatpush1.bf16.msra.mxu0 %v565_v24 }
  0x24   :  { %431 = vmatprep.subr.bf16.mxu0 %v566_v25  ;;  %v115_v58 = vrot.slane %v110_v56, %v114_v55  ;;  %v119_v59 = vrot.slane %v110_v56, %v118_v57 }
  0x27   :  { %432 = vmatpush1.bf16.msra.mxu0 %v568_v26  ;;  %v251_v26 = vld [vmem:[%s735_s5] sm:$0x3] }
  0x28   :  { %433 = vmatprep.subr.bf16.mxu0 %v569_v27  ;;  %v256_v27 = vrot.slane %v251_v26, %v114_v55 }
  0x2b   :  { %434 = vmatpush1.bf16.msra.mxu0 %v571_v28  ;;  %v260_v28 = vrot.slane %v251_v26, %v118_v57 }
  0x2c   :  { %435 = vmatprep.subr.bf16.mxu0 %v572_v29 }
  0x2f   :  { %436 = vmatpush1.bf16.msra.mxu0 %v574_v30 }
  0x30   :  { %437 = vmatprep.subr.bf16.mxu0 %v575_v36 }
  0x33   :  { %438 = vmatpush1.bf16.msra.mxu0 %v577_v37 }
  0x34   :  { %439 = vmatprep.subr.bf16.mxu0 %v578_v38 }
  0x37   :  { %440 = vmatpush1.bf16.msra.mxu0 %v580_v39 }
  0x38   :  { %441 = vmatprep.subr.bf16.mxu0 %v581_v40 }
  0x3b   :  { %442 = vmatpush1.bf16.msra.mxu0 %v583_v41 }
  0x3c   :  { %443 = vmatprep.subr.bf16.mxu0 %v584_v42 }
  0x3f   :  { %444 = vmatpush1.bf16.msra.mxu0 %v586_v43 }
  0x40   :  { %445 = vmatprep.subr.bf16.mxu0 %v587_v44 }
  0x43   :  { %446 = vmatpush1.bf16.msra.mxu0 %v589_v45 }
  0x44   :  { %447 = vmatprep.subr.bf16.mxu0 %v590_v46 }
  0x47   :  { %448 = vmatpush1.bf16.msra.mxu0 %v592_v47 }
  0x48   :  { %449 = vmatprep.subr.bf16.mxu0 %v593_v48 }
  0x4b   :  { %450 = vmatpush1.bf16.msra.mxu0 %v595_v49 }
  0x4c   :  { %451 = vmatprep.subr.bf16.mxu0 %v596_v50 }
  0x4f   :  { %452 = vmatpush1.bf16.msra.mxu0 %v598_v51 }
  0x50   :  { %453 = vmatprep.subr.bf16.mxu0 %v599_v52 }
  0x53   :  { %454 = vmatpush1.bf16.msra.mxu0 %v601_v53 }
  0x93   :  { %v44_v9 = vpop.permute.xlu0 %43 }
  0x94   :  { %vm48_vm2 = vcmp.eq.s32.totalorder %v44_v9, %v41_v8 }
  0x95   :  { %v485_v11 = vsel %vm48_vm2, 1.0, %v646_v1 }
  0x97   :  { %v47_v10 = vpop.permute.xlu0 %46 }
  0x98   :  { %vm49_vm3 = vcmp.eq.s32.totalorder %v47_v10, %v41_v8 }
  0x99   :  { %v486_v12 = vsel %vm49_vm3, 1.0, %v646_v1 }
  0x9a   :  { %v54_v14 = vpack.c.bf16 %v486_v12, %v485_v11 }
  0x9c   :  { %538 = vmatmul.mubr.msk.bf16.vlgmr.msra.gmra.mrb[0].mxu1 %vm56_vm4, %v54_v14 }
  0x9d   :  { %147 = vmatpush1.bf16.msra.mxu1 %v548_v13  ;;  %178 = vmatprep.mubr.bf16.mxu1 %v645_v0 }
  0x9e   :  { %148 = vmatprep.subr.bf16.mxu1 %v553_v15 }
  0xa1   :  { %149 = vmatpush1.bf16.msra.mxu1 %v551_v16 }
 0x16f   :  { %v98_v31 = vpop.f32.mrb[0].mxu1 }
 0x170   :  { %v539_v32 = vpop.f32.mrb[1].mxu1 }
 0x171   :  { %v101_v33 = vpop.f32.mrb[2].mxu1 }
 0x172   :  { %v105_v34 = vpack.c.bf16 %v101_v33, %v98_v31  ;;  %v540_v35 = vpop.f32.mrb[3].mxu1 }
 0x174   :  { %492 = vmatmul.mubr.msk.bf16.vlgmr.msra.gmra.mrb[4].mxu1 %vm142_vm5, %v105_v34 }
 0x247   :  { %v180_v60 = vpop.f32.mrb[4].mxu1 }
 0x248   :  { %v181_v61 = vadd.f32 %v180_v60, %v115_v58  ;;  %v182_v62 = vpop.f32.mrb[5].mxu1 }
 0x249   :  { %v183_v63 = vadd.f32 %v182_v62, %v119_v59  ;;  %v184_v0 = vpop.f32.mrb[6].mxu1 }
 0x24a   :  { %v493_v1 = vmul.f32 -1.442695, %v181_v61  ;;  %v185_v2 = vadd.f32 %v184_v0, %v115_v58  ;;  %v186_v3 = vpop.f32.mrb[7].mxu1 }
 0x24b   :  { %v494_v4 = vmul.f32 -1.442695, %v183_v63  ;;  %v187_v5 = vadd.f32 %v186_v3, %v119_v59 }
 0x24c   :  { %602 = vpow2.f32 %v493_v1  ;;  %v495_v6 = vmul.f32 -1.442695, %v185_v2 }
 0x24d   :  { %604 = vpow2.f32 %v494_v4  ;;  %v496_v7 = vmul.f32 -1.442695, %v187_v5 }
 0x24e   :  { %606 = vpow2.f32 %v495_v6 }
 0x24f   :  { %608 = vpow2.f32 %v496_v7 }
 0x256   :  { %v603_v8 = vpop.eup %602 }
 0x257   :  { %v605_v9 = vpop.eup %604  ;;  %v201_v10 = vadd.f32 1.0, %v603_v8 }
 0x258   :  { %v607_v11 = vpop.eup %606  ;;  %v202_v12 = vadd.f32 1.0, %v605_v9 }
 0x259   :  { %v609_v13 = vpop.eup %608  ;;  %610 = vrcp.f32 %v201_v10  ;;  %v203_v14 = vadd.f32 1.0, %v607_v11 }
 0x25a   :  { %612 = vrcp.f32 %v202_v12  ;;  %v204_v15 = vadd.f32 1.0, %v609_v13 }
 0x25b   :  { %614 = vrcp.f32 %v203_v14 }
 0x25c   :  { %616 = vrcp.f32 %v204_v15 }
 0x263   :  { %v611_v16 = vpop.eup %610 }
 0x264   :  { %v613_v17 = vpop.eup %612  ;;  %v213_v20 = vmul.f32 %v611_v16, %v181_v61 }
 0x265   :  { %v615_v18 = vpop.eup %614  ;;  %v214_v22 = vmul.f32 %v613_v17, %v183_v63 }
 0x266   :  { %v617_v19 = vpop.eup %616  ;;  %v215_v21 = vmul.f32 %v615_v18, %v185_v2 }
 0x267   :  { %v216_v23 = vmul.f32 %v617_v19, %v187_v5 }
 0x268   :  { %v217_v24 = vpack.c.bf16 %v215_v21, %v213_v20 }
 0x269   :  { %v218_v25 = vpack.c.bf16 %v216_v23, %v214_v22 }
 0x26b   :  { %455 = vmatprep.mubr.bf16.mxu0 %v218_v25 }
 0x26c   :  { %456 = vmatmul.mubr.bf16.vlgmr.msra.gmra.mrb[0].mxu0 %v217_v24 }
 0x33f   :  { %v457_v29 = vpop.f32.mrb[0].mxu0 }
 0x340   :  { %v458_v30 = vadd.f32 %v457_v29, %v256_v27  ;;  %v459_v31 = vpop.f32.mrb[1].mxu0 }
 0x341   :  { %v460_v32 = vadd.f32 %v459_v31, %v260_v28  ;;  %v461_v33 = vpop.f32.mrb[2].mxu0 }
 0x342   :  { %v462_v34 = vadd.f32 %v461_v33, %v256_v27  ;;  %v463_v35 = vpop.f32.mrb[3].mxu0 }
 0x343   :  { %v531_v36 = vpack.c.bf16 %v460_v32, %v458_v30  ;;  %v464_v37 = vadd.f32 %v463_v35, %v260_v28 }
 0x345   :  { %478 = vst [vmem:[%s736_s6] sm:$0xff] %v531_v36  ;;  %v532_v38 = vpack.c.bf16 %v464_v37, %v462_v34 }
 0x347   :  { %479 = vst [vmem:[%s736_s6 + $0x8] sm:$0xff] %v532_v38 }
 0x348   :  { %484 = vsyncpa [#allocation3], 1 }

</bundles_post_ra>
